<compile_context>
chip_gen: v5e
topology: v5e:2x2
jax: 0.10.0
libtpu: 0.0.40
codegen_flags: <defaults>
</compile_context>

<pallas_src>
import functools
from typing import NamedTuple

import jax
import jax.numpy as jnp
from jax.experimental import pallas as pl
from jax.experimental.pallas import tpu as pltpu


def _round_up(x, m):
    return (x + m - 1) // m * m


class PackedQNetwork(NamedTuple):
    """QNetwork params packed/padded for the fused kernel.

    Pack ONCE (at init / after every optimizer step), not per forward call.
    The int fields are static metadata; if you jit qnetwork_forward, close over
    this object instead of passing it as a traced argument.
    """
    w_first: jax.Array    # [in_pad, h_pad]        bf16
    b_first: jax.Array    # [1, h_pad]             f32
    w_hidden: jax.Array   # [n_hb, h_pad, h_pad]   bf16  (n_hb = max(n_hidden, 1))
    b_hidden: jax.Array   # [n_hb, 1, h_pad]       f32
    w_last: jax.Array     # [h_pad, out_pad]       bf16
    b_last: jax.Array     # [1, out_pad]           f32
    in_dim: int
    out_dim: int
    n_hidden: int         # number of hidden (h_dim -> h_dim) linears actually used


def pack_qnetwork_params(params, *, weight_dtype=jnp.bfloat16):
    """Pad + pack per-layer (W [in, out], b [out]) params for the kernel.

    First and last layers are kept separate from the hidden stack so that
    input_dim / output_dim padding does not inflate the hidden-layer weights.
    Weights are rounded to bf16 once, here (documented precision choice).
    """
    n_linear = len(params)
    assert n_linear >= 2, "QNetwork always has at least 2 linears (n_layers >= 1)"
    in_dim = params[0][0].shape[0]
    h_dim = params[0][0].shape[1]
    out_dim = params[-1][0].shape[1]
    n_hidden = n_linear - 2

    in_pad = _round_up(in_dim, 128)
    h_pad = _round_up(h_dim, 128)
    out_pad = _round_up(out_dim, 128)
    n_hb = max(n_hidden, 1)

    w0, b0 = params[0]
    wl, bl = params[-1]

    w_first = jnp.zeros((in_pad, h_pad), weight_dtype)
    w_first = w_first.at[:in_dim, :h_dim].set(w0.astype(weight_dtype))
    b_first = jnp.zeros((1, h_pad), jnp.float32)
    b_first = b_first.at[0, :h_dim].set(b0.astype(jnp.float32))

    w_hidden = jnp.zeros((n_hb, h_pad, h_pad), weight_dtype)
    b_hidden = jnp.zeros((n_hb, 1, h_pad), jnp.float32)
    for li in range(n_hidden):
        w, b = params[1 + li]
        w_hidden = w_hidden.at[li, :h_dim, :h_dim].set(w.astype(weight_dtype))
        b_hidden = b_hidden.at[li, 0, :h_dim].set(b.astype(jnp.float32))

    w_last = jnp.zeros((h_pad, out_pad), weight_dtype)
    w_last = w_last.at[:h_dim, :out_dim].set(wl.astype(weight_dtype))
    b_last = jnp.zeros((1, out_pad), jnp.float32)
    b_last = b_last.at[0, :out_dim].set(bl.astype(jnp.float32))

    return PackedQNetwork(w_first, b_first, w_hidden, b_hidden, w_last, b_last,
                          in_dim, out_dim, n_hidden)


def _mlp_kernel(x_ref, wf_ref, bf_ref, wh_ref, bh_ref, wl_ref, bl_ref, out_ref,
                *, n_hidden):
    """Fused MLP forward on one batch tile.

    x_ref:  [block_b, in_pad]       bf16 (zero-padded features)
    wf_ref: [in_pad, h_pad]         bf16
    bf_ref: [1, h_pad]              f32
    wh_ref: [n_hb, h_pad, h_pad]    bf16
    bh_ref: [n_hb, 1, h_pad]        f32
    wl_ref: [h_pad, out_pad]        bf16
    bl_ref: [1, out_pad]            f32
    out_ref:[block_b, out_pad]      f32 (lane-dense padded output)
    """
    h = x_ref[...]                                           # bf16 -> MXU directly
    acc = jnp.dot(h, wf_ref[...], preferred_element_type=jnp.float32) + bf_ref[...]
    # ReLU in f32 then downcast (safe on v5e which lacks bf16 VALU; on v6e/v7x a
    # fused bf16 max would be marginally cheaper but the kernel is MXU-bound).
    h = jnp.maximum(acc, 0.0).astype(jnp.bfloat16)
    for li in range(n_hidden):                               # static unroll
        acc = (jnp.dot(h, wh_ref[li], preferred_element_type=jnp.float32)
               + bh_ref[li])
        h = jnp.maximum(acc, 0.0).astype(jnp.bfloat16)
    out = jnp.dot(h, wl_ref[...], preferred_element_type=jnp.float32) + bl_ref[...]
    out_ref[...] = out.astype(out_ref.dtype)                 # single lane-dense store


def _default_block_b(B):
    """Batch-tile heuristic.

    * Capped at 256: at block_b=512 the f32 accumulator alone fills the vreg
      file in the unrolled 7-layer loop (guaranteed spills).
    * For B >= 32 we aim for >= 2 grid programs so both TensorCores of a 2-TC
      part (v7x) get work; harmless on 1-TC chips (v5e/v6e).
    * Tiny batches run as a single full-batch tile (grid=(1,)).
    """
    if B > 512:
        return 256
    if B > 256:
        return 128
    if B >= 32:
        return min(256, _round_up((B + 1) // 2, 8))
    return B


def qnetwork_forward(x, packed: PackedQNetwork, *, block_b=None):
    """x: [B, input_dim] f32.  packed: PackedQNetwork from pack_qnetwork_params."""
    B, in_dim = x.shape
    assert in_dim == packed.in_dim, (in_dim, packed.in_dim)
    in_pad, h_pad = packed.w_first.shape
    out_pad = packed.w_last.shape[1]
    n_hidden = packed.n_hidden
    n_hb = packed.w_hidden.shape[0]

    if block_b is None:
        block_b = _default_block_b(B)
    block_b = min(block_b, 256)
    # Pad the batch with zero rows (sliced off below) instead of a full-batch
    # grid=(1,) fallback: keeps x/out DMA pipelining and megacore sharding alive.
    b_padded = _round_up(B, block_b)
    grid_b = b_padded // block_b

    # Pad + downcast activations once in the wrapper (bf16 halves the x DMA).
    # Padded lanes/rows stay exactly 0 through the net (zero weights/bias, ReLU).
    x_pad = jnp.pad(x.astype(jnp.bfloat16),
                    ((0, b_padded - B), (0, in_pad - in_dim)))

    flops = 2 * b_padded * (in_pad * h_pad + n_hidden * h_pad * h_pad
                            + h_pad * out_pad)
    weight_bytes = 2 * (packed.w_first.size + packed.w_hidden.size
                        + packed.w_last.size)                       # bf16
    bias_bytes = 4 * (packed.b_first.size + packed.b_hidden.size
                      + packed.b_last.size)                         # f32
    act_tile_bytes = block_b * (in_pad * 2 + out_pad * 4)
    bytes_accessed = (weight_bytes + bias_bytes + x_pad.size * 2
                      + b_padded * out_pad * 4)
    # Raise scoped VMEM only when the packed weights actually need it
    # (large h_dim); never set it below a safe 32 MiB floor.
    vmem_needed = 2 * (weight_bytes + bias_bytes) + 4 * act_tile_bytes + (8 << 20)
    vmem_limit = int(min(128 << 20, max(32 << 20, vmem_needed)))

    kernel = functools.partial(_mlp_kernel, n_hidden=n_hidden)

    out_padded = pl.pallas_call(
        kernel,
        out_shape=jax.ShapeDtypeStruct((b_padded, out_pad), jnp.float32),
        grid_spec=pl.GridSpec(
            grid=(grid_b,),
            in_specs=[
                # batch tile of activations (bf16)
                pl.BlockSpec((block_b, in_pad), lambda i: (i, 0)),
                # weights/biases: constant block index -> fetched once and
                # VMEM-resident across all batch tiles (no re-DMA).
                pl.BlockSpec((in_pad, h_pad), lambda i: (0, 0)),
                pl.BlockSpec((1, h_pad), lambda i: (0, 0)),
                pl.BlockSpec((n_hb, h_pad, h_pad), lambda i: (0, 0, 0)),
                pl.BlockSpec((n_hb, 1, h_pad), lambda i: (0, 0, 0)),
                pl.BlockSpec((h_pad, out_pad), lambda i: (0, 0)),
                pl.BlockSpec((1, out_pad), lambda i: (0, 0)),
            ],
            out_specs=pl.BlockSpec((block_b, out_pad), lambda i: (i, 0)),
        ),
        compiler_params=pltpu.CompilerParams(
            dimension_semantics=("parallel",),
            vmem_limit_bytes=vmem_limit,
        ),
        cost_estimate=pl.CostEstimate(flops=flops, transcendentals=0,
                                      bytes_accessed=bytes_accessed),
    )(x_pad, packed.w_first, packed.b_first, packed.w_hidden, packed.b_hidden,
      packed.w_last, packed.b_last)

    return out_padded[:B, :packed.out_dim]


def init_qnetwork_params(key, input_dim, output_dim, h_dim=128, n_layers=6):
    """torch.nn.Linear-style init: U(-1/sqrt(fan_in), +1/sqrt(fan_in)).

    Returns list of (W [in, out], b [out]) — W already transposed vs torch.
    """
    dims = [input_dim] + [h_dim] * n_layers + [output_dim]
    params = []
    for li in range(len(dims) - 1):
        fan_in, fan_out = dims[li], dims[li + 1]
        key, kw, kb = jax.random.split(key, 3)
        bound = 1.0 / jnp.sqrt(jnp.float32(fan_in))
        w = jax.random.uniform(kw, (fan_in, fan_out), jnp.float32, -bound, bound)
        b = jax.random.uniform(kb, (fan_out,), jnp.float32, -bound, bound)
        params.append((w, b))
    return params


def qnetwork_reference(x, params):
    """Pure-JAX reference using the same bf16-weight / f32-accumulate precision."""
    h = x
    for li, (w, b) in enumerate(params):
        h = jnp.dot(h.astype(jnp.bfloat16), w.astype(jnp.bfloat16),
                    preferred_element_type=jnp.float32) + b
        if li < len(params) - 1:
            h = jnp.maximum(h, 0.0)
    return h


if __name__ == "__main__":
    key = jax.random.PRNGKey(0)
    k_x, k_p = jax.random.split(key)

    # Small shapes consistent with the module: state vector in, Q-values out.
    batch, input_dim, output_dim, h_dim, n_layers = 16, 16, 4, 128, 6

    x = jax.random.normal(k_x, (batch, input_dim), jnp.float32)
    params = init_qnetwork_params(k_p, input_dim, output_dim, h_dim=h_dim,
                                  n_layers=n_layers)

    # Pack ONCE (outside the forward / RL loop), then reuse every step.
    packed = pack_qnetwork_params(params)

    out = qnetwork_forward(x, packed)      # block_b auto -> full batch, grid=(1,)
    out = jax.block_until_ready(out)

    ref = qnetwork_reference(x, params)
    assert out.shape == (batch, output_dim), out.shape
    assert jnp.allclose(out, ref, atol=2e-2, rtol=2e-2), \
        f"max abs err {jnp.max(jnp.abs(out - ref))}"

    print("KERNEL_OK")
</pallas_src>

<mosaic_0001>
module attributes {stable_mosaic.version = 11 : i64} {
  func.func @_mlp_kernel(%arg0: i32, %arg1: memref<16x128xbf16, #tpu.memory_space<vmem>>, %arg2: memref<128x128xbf16, #tpu.memory_space<vmem>>, %arg3: memref<1x128xf32, #tpu.memory_space<vmem>>, %arg4: memref<5x128x128xbf16, #tpu.memory_space<vmem>>, %arg5: memref<5x1x128xf32, #tpu.memory_space<vmem>>, %arg6: memref<128x128xbf16, #tpu.memory_space<vmem>>, %arg7: memref<1x128xf32, #tpu.memory_space<vmem>>, %arg8: memref<16x128xf32, #tpu.memory_space<vmem>>) attributes {dimension_semantics = [#tpu.dimension_semantics<parallel>], iteration_bounds = array<i64: 1>, scalar_prefetch = 0 : i64, scratch_operands = 0 : i64, tpu.core_type = #tpu.core_type<tc>, window_params = [{transform_indices = @transform_0, window_bounds = array<i64: 16, 128>}, {pipeline_mode = #tpu.pipeline_mode<synchronous>, transform_indices = @transform_1, window_bounds = array<i64: 128, 128>}, {pipeline_mode = #tpu.pipeline_mode<synchronous>, transform_indices = @transform_2, window_bounds = array<i64: 1, 128>}, {pipeline_mode = #tpu.pipeline_mode<synchronous>, transform_indices = @transform_3, window_bounds = array<i64: 5, 128, 128>}, {pipeline_mode = #tpu.pipeline_mode<synchronous>, transform_indices = @transform_4, window_bounds = array<i64: 5, 1, 128>}, {pipeline_mode = #tpu.pipeline_mode<synchronous>, transform_indices = @transform_5, window_bounds = array<i64: 128, 128>}, {pipeline_mode = #tpu.pipeline_mode<synchronous>, transform_indices = @transform_6, window_bounds = array<i64: 1, 128>}, {transform_indices = @transform_7, window_bounds = array<i64: 16, 128>}]} {
    %c0 = arith.constant 0 : index
    %c0_0 = arith.constant 0 : index
    %0 = vector.load %arg1[%c0, %c0_0] : memref<16x128xbf16, #tpu.memory_space<vmem>>, vector<16x128xbf16>
    %c0_1 = arith.constant 0 : index
    %c0_2 = arith.constant 0 : index
    %1 = vector.load %arg2[%c0_1, %c0_2] : memref<128x128xbf16, #tpu.memory_space<vmem>>, vector<128x128xbf16>
    %cst = arith.constant dense<0.000000e+00> : vector<16x128xf32>
    %2 = tpu.matmul %0, %1, %cst {dimension_numbers = #tpu.dot_dimension_numbers<[1], [0], [0], [1], [0, 0, 1, 1], [], []>} : vector<16x128xbf16>, vector<128x128xbf16>, vector<16x128xf32> -> vector<16x128xf32>
    %c0_3 = arith.constant 0 : index
    %c0_4 = arith.constant 0 : index
    %3 = vector.load %arg3[%c0_3, %c0_4] : memref<1x128xf32, #tpu.memory_space<vmem>>, vector<1x128xf32>
    %4 = vector.broadcast %3 : vector<1x128xf32> to vector<16x128xf32>
    %5 = arith.addf %2, %4 : vector<16x128xf32>
    %cst_5 = arith.constant 0.000000e+00 : f32
    %6 = vector.broadcast %cst_5 : f32 to vector<16x128xf32>
    %7 = arith.maximumf %5, %6 : vector<16x128xf32>
    %8 = arith.truncf %7 : vector<16x128xf32> to vector<16x128xbf16>
    %c0_6 = arith.constant 0 : index
    %c0_7 = arith.constant 0 : index
    %c0_8 = arith.constant 0 : index
    %9 = vector.load %arg4[%c0_6, %c0_7, %c0_8] : memref<5x128x128xbf16, #tpu.memory_space<vmem>>, vector<1x128x128xbf16>
    %10 = vector.shape_cast %9 : vector<1x128x128xbf16> to vector<128x128xbf16>
    %cst_9 = arith.constant dense<0.000000e+00> : vector<16x128xf32>
    %11 = tpu.matmul %8, %10, %cst_9 {dimension_numbers = #tpu.dot_dimension_numbers<[1], [0], [0], [1], [0, 0, 1, 1], [], []>} : vector<16x128xbf16>, vector<128x128xbf16>, vector<16x128xf32> -> vector<16x128xf32>
    %c0_10 = arith.constant 0 : index
    %c0_11 = arith.constant 0 : index
    %c0_12 = arith.constant 0 : index
    %12 = vector.load %arg5[%c0_10, %c0_11, %c0_12] : memref<5x1x128xf32, #tpu.memory_space<vmem>>, vector<1x1x128xf32>
    %13 = vector.shape_cast %12 : vector<1x1x128xf32> to vector<1x128xf32>
    %14 = vector.broadcast %13 : vector<1x128xf32> to vector<16x128xf32>
    %15 = arith.addf %11, %14 : vector<16x128xf32>
    %cst_13 = arith.constant 0.000000e+00 : f32
    %16 = vector.broadcast %cst_13 : f32 to vector<16x128xf32>
    %17 = arith.maximumf %15, %16 : vector<16x128xf32>
    %18 = arith.truncf %17 : vector<16x128xf32> to vector<16x128xbf16>
    %c1 = arith.constant 1 : index
    %c0_14 = arith.constant 0 : index
    %c0_15 = arith.constant 0 : index
    %19 = vector.load %arg4[%c1, %c0_14, %c0_15] : memref<5x128x128xbf16, #tpu.memory_space<vmem>>, vector<1x128x128xbf16>
    %20 = vector.shape_cast %19 : vector<1x128x128xbf16> to vector<128x128xbf16>
    %cst_16 = arith.constant dense<0.000000e+00> : vector<16x128xf32>
    %21 = tpu.matmul %18, %20, %cst_16 {dimension_numbers = #tpu.dot_dimension_numbers<[1], [0], [0], [1], [0, 0, 1, 1], [], []>} : vector<16x128xbf16>, vector<128x128xbf16>, vector<16x128xf32> -> vector<16x128xf32>
    %c1_17 = arith.constant 1 : index
    %c0_18 = arith.constant 0 : index
    %c0_19 = arith.constant 0 : index
    %22 = vector.load %arg5[%c1_17, %c0_18, %c0_19] : memref<5x1x128xf32, #tpu.memory_space<vmem>>, vector<1x1x128xf32>
    %23 = vector.shape_cast %22 : vector<1x1x128xf32> to vector<1x128xf32>
    %24 = vector.broadcast %23 : vector<1x128xf32> to vector<16x128xf32>
    %25 = arith.addf %21, %24 : vector<16x128xf32>
    %cst_20 = arith.constant 0.000000e+00 : f32
    %26 = vector.broadcast %cst_20 : f32 to vector<16x128xf32>
    %27 = arith.maximumf %25, %26 : vector<16x128xf32>
    %28 = arith.truncf %27 : vector<16x128xf32> to vector<16x128xbf16>
    %c2 = arith.constant 2 : index
    %c0_21 = arith.constant 0 : index
    %c0_22 = arith.constant 0 : index
    %29 = vector.load %arg4[%c2, %c0_21, %c0_22] : memref<5x128x128xbf16, #tpu.memory_space<vmem>>, vector<1x128x128xbf16>
    %30 = vector.shape_cast %29 : vector<1x128x128xbf16> to vector<128x128xbf16>
    %cst_23 = arith.constant dense<0.000000e+00> : vector<16x128xf32>
    %31 = tpu.matmul %28, %30, %cst_23 {dimension_numbers = #tpu.dot_dimension_numbers<[1], [0], [0], [1], [0, 0, 1, 1], [], []>} : vector<16x128xbf16>, vector<128x128xbf16>, vector<16x128xf32> -> vector<16x128xf32>
    %c2_24 = arith.constant 2 : index
    %c0_25 = arith.constant 0 : index
    %c0_26 = arith.constant 0 : index
    %32 = vector.load %arg5[%c2_24, %c0_25, %c0_26] : memref<5x1x128xf32, #tpu.memory_space<vmem>>, vector<1x1x128xf32>
    %33 = vector.shape_cast %32 : vector<1x1x128xf32> to vector<1x128xf32>
    %34 = vector.broadcast %33 : vector<1x128xf32> to vector<16x128xf32>
    %35 = arith.addf %31, %34 : vector<16x128xf32>
    %cst_27 = arith.constant 0.000000e+00 : f32
    %36 = vector.broadcast %cst_27 : f32 to vector<16x128xf32>
    %37 = arith.maximumf %35, %36 : vector<16x128xf32>
    %38 = arith.truncf %37 : vector<16x128xf32> to vector<16x128xbf16>
    %c3 = arith.constant 3 : index
    %c0_28 = arith.constant 0 : index
    %c0_29 = arith.constant 0 : index
    %39 = vector.load %arg4[%c3, %c0_28, %c0_29] : memref<5x128x128xbf16, #tpu.memory_space<vmem>>, vector<1x128x128xbf16>
    %40 = vector.shape_cast %39 : vector<1x128x128xbf16> to vector<128x128xbf16>
    %cst_30 = arith.constant dense<0.000000e+00> : vector<16x128xf32>
    %41 = tpu.matmul %38, %40, %cst_30 {dimension_numbers = #tpu.dot_dimension_numbers<[1], [0], [0], [1], [0, 0, 1, 1], [], []>} : vector<16x128xbf16>, vector<128x128xbf16>, vector<16x128xf32> -> vector<16x128xf32>
    %c3_31 = arith.constant 3 : index
    %c0_32 = arith.constant 0 : index
    %c0_33 = arith.constant 0 : index
    %42 = vector.load %arg5[%c3_31, %c0_32, %c0_33] : memref<5x1x128xf32, #tpu.memory_space<vmem>>, vector<1x1x128xf32>
    %43 = vector.shape_cast %42 : vector<1x1x128xf32> to vector<1x128xf32>
    %44 = vector.broadcast %43 : vector<1x128xf32> to vector<16x128xf32>
    %45 = arith.addf %41, %44 : vector<16x128xf32>
    %cst_34 = arith.constant 0.000000e+00 : f32
    %46 = vector.broadcast %cst_34 : f32 to vector<16x128xf32>
    %47 = arith.maximumf %45, %46 : vector<16x128xf32>
    %48 = arith.truncf %47 : vector<16x128xf32> to vector<16x128xbf16>
    %c4 = arith.constant 4 : index
    %c0_35 = arith.constant 0 : index
    %c0_36 = arith.constant 0 : index
    %49 = vector.load %arg4[%c4, %c0_35, %c0_36] : memref<5x128x128xbf16, #tpu.memory_space<vmem>>, vector<1x128x128xbf16>
    %50 = vector.shape_cast %49 : vector<1x128x128xbf16> to vector<128x128xbf16>
    %cst_37 = arith.constant dense<0.000000e+00> : vector<16x128xf32>
    %51 = tpu.matmul %48, %50, %cst_37 {dimension_numbers = #tpu.dot_dimension_numbers<[1], [0], [0], [1], [0, 0, 1, 1], [], []>} : vector<16x128xbf16>, vector<128x128xbf16>, vector<16x128xf32> -> vector<16x128xf32>
    %c4_38 = arith.constant 4 : index
    %c0_39 = arith.constant 0 : index
    %c0_40 = arith.constant 0 : index
    %52 = vector.load %arg5[%c4_38, %c0_39, %c0_40] : memref<5x1x128xf32, #tpu.memory_space<vmem>>, vector<1x1x128xf32>
    %53 = vector.shape_cast %52 : vector<1x1x128xf32> to vector<1x128xf32>
    %54 = vector.broadcast %53 : vector<1x128xf32> to vector<16x128xf32>
    %55 = arith.addf %51, %54 : vector<16x128xf32>
    %cst_41 = arith.constant 0.000000e+00 : f32
    %56 = vector.broadcast %cst_41 : f32 to vector<16x128xf32>
    %57 = arith.maximumf %55, %56 : vector<16x128xf32>
    %58 = arith.truncf %57 : vector<16x128xf32> to vector<16x128xbf16>
    %c0_42 = arith.constant 0 : index
    %c0_43 = arith.constant 0 : index
    %59 = vector.load %arg6[%c0_42, %c0_43] : memref<128x128xbf16, #tpu.memory_space<vmem>>, vector<128x128xbf16>
    %cst_44 = arith.constant dense<0.000000e+00> : vector<16x128xf32>
    %60 = tpu.matmul %58, %59, %cst_44 {dimension_numbers = #tpu.dot_dimension_numbers<[1], [0], [0], [1], [0, 0, 1, 1], [], []>} : vector<16x128xbf16>, vector<128x128xbf16>, vector<16x128xf32> -> vector<16x128xf32>
    %c0_45 = arith.constant 0 : index
    %c0_46 = arith.constant 0 : index
    %61 = vector.load %arg7[%c0_45, %c0_46] : memref<1x128xf32, #tpu.memory_space<vmem>>, vector<1x128xf32>
    %62 = vector.broadcast %61 : vector<1x128xf32> to vector<16x128xf32>
    %63 = arith.addf %60, %62 : vector<16x128xf32>
    %c0_47 = arith.constant 0 : index
    %c0_48 = arith.constant 0 : index
    %64 = vector.load %arg8[%c0_47, %c0_48] : memref<16x128xf32, #tpu.memory_space<vmem>>, vector<16x128xf32>
    tpu.vector_store %arg8[%c0_47, %c0_48], %63 {strides = array<i32>} : memref<16x128xf32, #tpu.memory_space<vmem>>, vector<16x128xf32>,
    return
  }
  func.func @transform_0(%arg0: i32) -> (i32, i32) {
    %c0_i32 = arith.constant 0 : i32
    %c0_i32_0 = arith.constant 0 : i32
    return %arg0, %c0_i32 : i32, i32
  }
  func.func @transform_1(%arg0: i32) -> (i32, i32) {
    %c0_i32 = arith.constant 0 : i32
    %c0_i32_0 = arith.constant 0 : i32
    %c0_i32_1 = arith.constant 0 : i32
    return %c0_i32, %c0_i32_0 : i32, i32
  }
  func.func @transform_2(%arg0: i32) -> (i32, i32) {
    %c0_i32 = arith.constant 0 : i32
    %c0_i32_0 = arith.constant 0 : i32
    %c0_i32_1 = arith.constant 0 : i32
    return %c0_i32, %c0_i32_0 : i32, i32
  }
  func.func @transform_3(%arg0: i32) -> (i32, i32, i32) {
    %c0_i32 = arith.constant 0 : i32
    %c0_i32_0 = arith.constant 0 : i32
    %c0_i32_1 = arith.constant 0 : i32
    %c0_i32_2 = arith.constant 0 : i32
    return %c0_i32, %c0_i32_0, %c0_i32_1 : i32, i32, i32
  }
  func.func @transform_4(%arg0: i32) -> (i32, i32, i32) {
    %c0_i32 = arith.constant 0 : i32
    %c0_i32_0 = arith.constant 0 : i32
    %c0_i32_1 = arith.constant 0 : i32
    %c0_i32_2 = arith.constant 0 : i32
    return %c0_i32, %c0_i32_0, %c0_i32_1 : i32, i32, i32
  }
  func.func @transform_5(%arg0: i32) -> (i32, i32) {
    %c0_i32 = arith.constant 0 : i32
    %c0_i32_0 = arith.constant 0 : i32
    %c0_i32_1 = arith.constant 0 : i32
    return %c0_i32, %c0_i32_0 : i32, i32
  }
  func.func @transform_6(%arg0: i32) -> (i32, i32) {
    %c0_i32 = arith.constant 0 : i32
    %c0_i32_0 = arith.constant 0 : i32
    %c0_i32_1 = arith.constant 0 : i32
    return %c0_i32, %c0_i32_0 : i32, i32
  }
  func.func @transform_7(%arg0: i32) -> (i32, i32) {
    %c0_i32 = arith.constant 0 : i32
    %c0_i32_0 = arith.constant 0 : i32
    return %arg0, %c0_i32 : i32, i32
  }
}

</mosaic_0001>

<bundles_post_ra>
// kernel: tpu_custom_call.1
= control target key start
LH: loop header
LB: loop body
LE: loop exit
PB: predicated region body
PF: predicated region fallthrough
CT: control target
= control target key end

     0   :  { %12 = vsyncpa [#allocation3], 0  ;;  %s1280_s0 = inlined_call_operand.hbm [shape: bf16[16,128], index: 0, kind: input, shape index: {}]   ;;  %s1281_s1 = inlined_call_operand.hbm [shape: bf16[128,128], index: 1, kind: input, shape index: {}]   ;;  %s1282_s2 = inlined_call_operand.vmem [shape: f32[1,128], index: 2, kind: input, shape index: {}]   ;;  %s1283_s3 = inlined_call_operand.hbm [shape: bf16[5,128,128], index: 3, kind: input, shape index: {}]   ;;  %s1284_s4 = inlined_call_operand.hbm [shape: f32[5,1,128], index: 4, kind: input, shape index: {}]   ;;  %s1285_s5 = inlined_call_operand.hbm [shape: bf16[128,128], index: 5, kind: input, shape index: {}]   ;;  %s1286_s6 = inlined_call_operand.vmem [shape: f32[1,128], index: 6, kind: input, shape index: {}]   ;;  %s1287_s7 = inlined_call_operand.hbm [shape: f32[16,128], index: 7, kind: output, shape index: {}]  }
   0x1   :  { %13 = vsyncpa [#allocation6], 0 }
   0x2   :  { %14 = vsyncpa [#allocation9], 0 }
   0x3   :  { %15 = vsyncpa [#allocation4], 0  ;;  %s33_s26 = sshll.u32 %s1281_s1, 4  ;;  %s1192_s27 = smov [#allocation5]   ;;  %s34_s26 = int_to_ptr.hbm [resolvable:$true] %s33_s26 }
   0x4   :  { %s35_s28 = sshll.u32 %s1192_s27, 4  ;;  %s61_s8 = sshll.u32 %s1284_s4, 4  ;;  %s36_s28 = int_to_ptr.vmem [resolvable:$true] %s35_s28  ;;  %s62_s8 = int_to_ptr.hbm [resolvable:$true] %s61_s8 }
   0x5   :  { %s1193_s9 = smov 64   ;;  %s1194_s10 = smov 4  }
   0x6   :  { %41 = dma.hbm_to_vmem [thread:$0]  %s34_s26, 1024, %s36_s28, [#allocation6], %s1193_s9, %s1193_s9, %s1194_s10  }
   0x7   :  { %s1195_s11 = smov [#allocation8]   ;;  %s1196_s13 = smov 16  }
   0x8   :  { %s63_s12 = sshll.u32 %s1195_s11, 4  ;;  %s1197_s1 = smov 1   ;;  %s64_s12 = int_to_ptr.vmem [resolvable:$true] %s63_s12 }
   0x9   :  { %69 = dma.hbm_to_vmem [thread:$0]  %s62_s8, 80, %s64_s12, [#allocation9], %s1196_s13, %s1196_s13, %s1197_s1  }
   0xa   :  { %s20_s16 = sshll.u32 %s1280_s0, 4  ;;  %s1198_s17 = smov [#allocation2]   ;;  %s21_s16 = int_to_ptr.hbm [resolvable:$true] %s20_s16 }
   0xb   :  { %s22_s4 = sshll.u32 %s1198_s17, 4  ;;  %s48_s20 = sshll.u32 %s1283_s3, 4  ;;  %s23_s4 = int_to_ptr.vmem [resolvable:$true] %s22_s4  ;;  %s49_s20 = int_to_ptr.hbm [resolvable:$true] %s48_s20 }
   0xc   :  { %28 = dma.hbm_to_vmem [thread:$0]  %s21_s16, 128, %s23_s4, [#allocation3], %s1193_s9, %s1193_s9, %s1194_s10  }
   0xd   :  { %s1199_s21 = smov [#allocation7]   ;;  %s74_s25 = sshll.u32 %s1285_s5, 4  ;;  %s75_s25 = int_to_ptr.hbm [resolvable:$true] %s74_s25 }
   0xe   :  { %s50_s22 = sshll.u32 %s1199_s21, 4  ;;  %s1200_s0 = smov [#allocation10]   ;;  %s51_s22 = int_to_ptr.vmem [resolvable:$true] %s50_s22 }
   0xf   :  { %56 = dma.hbm_to_vmem [thread:$0]  %s49_s20, 5120, %s51_s22, [#allocation6], %s1193_s9, %s1193_s9, %s1194_s10  }
  0x10   :  { %s76_s26 = sshll.u32 %s1200_s0, 4  ;;  %s77_s26 = int_to_ptr.vmem [resolvable:$true] %s76_s26 }
  0x11   :  { %82 = dma.hbm_to_vmem [thread:$0]  %s75_s25, 1024, %s77_s26, [#allocation9], %s1193_s9, %s1193_s9, %s1194_s10  }
  0x12   :  { %1184 = dma.done.wait [#allocation3], 128  }
  0x13   :  { %1185 = vsyncadd [#allocation3], 4294967168 }
  0x14   :  { %1186 = dma.done.wait [#allocation6], 6144  }
  0x15   :  { %1187 = vsyncadd [#allocation6], 4294961152 }
  0x16   :  { %1188 = dma.done.wait [#allocation9], 1104  }
  0x17   :  { %1189 = vsyncadd [#allocation9], 4294966192  ;;  %v972_v0 = vld [vmem:[#allocation5 + $0x38] sm:$0xff]  ;;  %v971_v1 = vld [vmem:[#allocation5 + $0x30] sm:$0xff]  ;;  %s1201_s28 = smov [#allocation11]   ;;  %s721_s9 = sshll.u32 %s1287_s7, 4  ;;  %s722_s9 = int_to_ptr.hbm [resolvable:$true] %s721_s9 }
  0x18   :  { %181 = vmatpush.bf16.msra.mxu0 %v972_v0  ;;  %v980_v2 = vld [vmem:[#allocation7 + $0x38] sm:$0xff]  ;;  %v970_v3 = vld [vmem:[#allocation5 + $0x28] sm:$0xff]  ;;  %v979_v4 = vld [vmem:[#allocation7 + $0x30] sm:$0xff]  ;;  %s719_s29 = sshll.u32 %s1201_s28, 4  ;;  %s1202_s10 = smov 128   ;;  %s720_s29 = int_to_ptr.vmem [resolvable:$true] %s719_s29 }
  0x19   :  { %266 = vmatpush.bf16.msra.mxu1 %v980_v2  ;;  %v978_v5 = vld [vmem:[#allocation7 + $0x28] sm:$0xff]  ;;  %v969_v6 = vld [vmem:[#allocation5 + $0x20] sm:$0xff]  ;;  %v968_v8 = vld [vmem:[#allocation5 + $0x18] sm:$0xff]  ;;  %s1203_s11 = smov 8  }
  0x1a   :  { %v977_v7 = vld [vmem:[#allocation7 + $0x20] sm:$0xff]  ;;  %v967_v9 = vld [vmem:[#allocation5 + $0x10] sm:$0xff]  ;;  %v966_v10 = vld [vmem:[#allocation5 + $0x8] sm:$0xff] }
  0x1b   :  { %v965_v11 = vld [vmem:[#allocation5] sm:$0xff]  ;;  %v964_v12 = vld [vmem:[#allocation2] sm:$0xff]  ;;  %v975_v14 = vld [vmem:[#allocation7 + $0x10] sm:$0xff] }
  0x1c   :  { %182 = vmatpush.bf16.msra.mxu0 %v971_v1  ;;  %v976_v13 = vld [vmem:[#allocation7 + $0x18] sm:$0xff]  ;;  %v974_v15 = vld [vmem:[#allocation7 + $0x8] sm:$0xff]  ;;  %v973_v16 = vld [vmem:[#allocation7] sm:$0xff] }
  0x1d   :  { %267 = vmatpush.bf16.msra.mxu1 %v979_v4  ;;  %v988_v17 = vld [vmem:[#allocation7 + $0x78] sm:$0xff]  ;;  %v987_v18 = vld [vmem:[#allocation7 + $0x70] sm:$0xff]  ;;  %v986_v19 = vld [vmem:[#allocation7 + $0x68] sm:$0xff] }
  0x1e   :  { %353 = vmatpush.bf16.msra.mxu2 %v988_v17  ;;  %v985_v20 = vld [vmem:[#allocation7 + $0x60] sm:$0xff]  ;;  %v1033_v22 = vld [vmem:[%s1282_s2] ss:$0 sm:$0xff]  ;;  %v983_v30 = vld [vmem:[#allocation7 + $0x50] sm:$0xff] }
  0x1f   :  { %v984_v29 = vld [vmem:[#allocation7 + $0x58] sm:$0xff]  ;;  %v982_v31 = vld [vmem:[#allocation7 + $0x48] sm:$0xff]  ;;  %v981_v32 = vld [vmem:[#allocation7 + $0x40] sm:$0xff] }
  0x20   :  { %183 = vmatpush.bf16.msra.mxu0 %v970_v3  ;;  %v996_v33 = vld [vmem:[#allocation7 + $0xb8] sm:$0xff]  ;;  %v995_v34 = vld [vmem:[#allocation7 + $0xb0] sm:$0xff]  ;;  %v994_v35 = vld [vmem:[#allocation7 + $0xa8] sm:$0xff] }
  0x21   :  { %268 = vmatpush.bf16.msra.mxu1 %v978_v5  ;;  %440 = vmatpush.bf16.msra.mxu3 %v996_v33  ;;  %v993_v36 = vld [vmem:[#allocation7 + $0xa0] sm:$0xff]  ;;  %v992_v45 = vld [vmem:[#allocation7 + $0x98] sm:$0xff]  ;;  %v991_v46 = vld [vmem:[#allocation7 + $0x90] sm:$0xff] }
  0x22   :  { %354 = vmatpush.bf16.msra.mxu2 %v987_v18  ;;  %v1034_v38 = vld [vmem:[#allocation8] ss:$0 sm:$0xff]  ;;  %v990_v47 = vld [vmem:[#allocation7 + $0x88] sm:$0xff]  ;;  %v1004_v49 = vld [vmem:[#allocation7 + $0xf8] sm:$0xff] }
  0x23   :  { %v989_v48 = vld [vmem:[#allocation7 + $0x80] sm:$0xff]  ;;  %v1003_v50 = vld [vmem:[#allocation7 + $0xf0] sm:$0xff]  ;;  %v1002_v51 = vld [vmem:[#allocation7 + $0xe8] sm:$0xff] }
  0x24   :  { %184 = vmatpush.bf16.msra.mxu0 %v969_v6  ;;  %v1001_v52 = vld [vmem:[#allocation7 + $0xe0] sm:$0xff]  ;;  %v1000_v61 = vld [vmem:[#allocation7 + $0xd8] sm:$0xff]  ;;  %v999_v62 = vld [vmem:[#allocation7 + $0xd0] sm:$0xff] }
  0x25   :  { %269 = vmatpush.bf16.msra.mxu1 %v977_v7  ;;  %441 = vmatpush.bf16.msra.mxu3 %v995_v34  ;;  %v1035_v54 = vld [vmem:[#allocation8 + $0x1] ss:$0 sm:$0xff]  ;;  %v998_v63 = vld [vmem:[#allocation7 + $0xc8] sm:$0xff]  ;;  %v1012_v1 = vld [vmem:[#allocation7 + $0x138] sm:$0xff] }
  0x26   :  { %355 = vmatpush.bf16.msra.mxu2 %v986_v19  ;;  %v997_v0 = vld [vmem:[#allocation7 + $0xc0] sm:$0xff]  ;;  %v1011_v2 = vld [vmem:[#allocation7 + $0x130] sm:$0xff]  ;;  %v1010_v3 = vld [vmem:[#allocation7 + $0x128] sm:$0xff] }
  0x27   :  { %v1009_v4 = vld [vmem:[#allocation7 + $0x120] sm:$0xff]  ;;  %v1019_v18 = vld [vmem:[#allocation10 + $0x30] sm:$0xff]  ;;  %v1018_v19 = vld [vmem:[#allocation10 + $0x28] sm:$0xff] }
  0x28   :  { %185 = vmatpush.bf16.msra.mxu0 %v968_v8  ;;  %v1036_v6 = vld [vmem:[#allocation8 + $0x2] ss:$0 sm:$0xff]  ;;  %v1038_v34 = vld [vmem:[#allocation8 + $0x4] ss:$0 sm:$0xff] }
  0x29   :  { %270 = vmatpush.bf16.msra.mxu1 %v976_v13  ;;  %442 = vmatpush.bf16.msra.mxu3 %v994_v35  ;;  %v1008_v13 = vld [vmem:[#allocation7 + $0x118] sm:$0xff] }
  0x2a   :  { %356 = vmatpush.bf16.msra.mxu2 %v985_v20  ;;  %v1020_v17 = vld [vmem:[#allocation10 + $0x38] sm:$0xff]  ;;  %v1017_v20 = vld [vmem:[#allocation10 + $0x20] sm:$0xff] }
  0x2c   :  { %186 = vmatpush.bf16.msra.mxu0 %v967_v9 }
  0x2d   :  { %271 = vmatpush.bf16.msra.mxu1 %v975_v14  ;;  %443 = vmatpush.bf16.msra.mxu3 %v993_v36  ;;  %v1007_v14 = vld [vmem:[#allocation7 + $0x110] sm:$0xff] }
  0x2e   :  { %357 = vmatpush.bf16.msra.mxu2 %v984_v29  ;;  %v1016_v29 = vld [vmem:[#allocation10 + $0x18] sm:$0xff] }
  0x30   :  { %187 = vmatpush.bf16.msra.mxu0 %v966_v10 }
  0x31   :  { %272 = vmatpush.bf16.msra.mxu1 %v974_v15  ;;  %444 = vmatpush.bf16.msra.mxu3 %v992_v45  ;;  %v1006_v15 = vld [vmem:[#allocation7 + $0x108] sm:$0xff] }
  0x32   :  { %358 = vmatpush.bf16.msra.mxu2 %v983_v30  ;;  %v1015_v30 = vld [vmem:[#allocation10 + $0x10] sm:$0xff] }
  0x34   :  { %188 = vmatpush.bf16.msra.mxu0 %v965_v11 }
  0x35   :  { %273 = vmatpush.bf16.msra.mxu1 %v973_v16  ;;  %445 = vmatpush.bf16.msra.mxu3 %v991_v46  ;;  %v1005_v16 = vld [vmem:[#allocation7 + $0x100] sm:$0xff] }
  0x36   :  { %359 = vmatpush.bf16.msra.mxu2 %v982_v31  ;;  %v1014_v31 = vld [vmem:[#allocation10 + $0x8] sm:$0xff] }
  0x37   :  { %189 = vmatmul.bf16.vlgmr.msra.gmra.mxu0 %v964_v12 }
  0x38   :  { %527 = vmatpush.bf16.msrb.mxu0 %v1004_v49 }
  0x39   :  { %446 = vmatpush.bf16.msra.mxu3 %v990_v47  ;;  %614 = vmatpush.bf16.msrb.mxu1 %v1012_v1 }
  0x3a   :  { %360 = vmatpush.bf16.msra.mxu2 %v981_v32  ;;  %v1013_v32 = vld [vmem:[#allocation10] sm:$0xff] }
  0x3c   :  { %528 = vmatpush.bf16.msrb.mxu0 %v1003_v50 }
  0x3d   :  { %447 = vmatpush.bf16.msra.mxu3 %v989_v48  ;;  %615 = vmatpush.bf16.msrb.mxu1 %v1011_v2 }
  0x3e   :  { %699 = vmatpush.bf16.msrb.mxu2 %v1020_v17 }
  0x40   :  { %529 = vmatpush.bf16.msrb.mxu0 %v1002_v51 }
  0x41   :  { %616 = vmatpush.bf16.msrb.mxu1 %v1010_v3 }
  0x42   :  { %700 = vmatpush.bf16.msrb.mxu2 %v1019_v18 }
  0x44   :  { %530 = vmatpush.bf16.msrb.mxu0 %v1001_v52 }
  0x45   :  { %617 = vmatpush.bf16.msrb.mxu1 %v1009_v4 }
  0x46   :  { %701 = vmatpush.bf16.msrb.mxu2 %v1018_v19 }
  0x48   :  { %531 = vmatpush.bf16.msrb.mxu0 %v1000_v61 }
  0x49   :  { %618 = vmatpush.bf16.msrb.mxu1 %v1008_v13 }
  0x4a   :  { %702 = vmatpush.bf16.msrb.mxu2 %v1017_v20 }
  0x4c   :  { %532 = vmatpush.bf16.msrb.mxu0 %v999_v62 }
  0x4d   :  { %619 = vmatpush.bf16.msrb.mxu1 %v1007_v14 }
  0x4e   :  { %703 = vmatpush.bf16.msrb.mxu2 %v1016_v29 }
  0x50   :  { %533 = vmatpush.bf16.msrb.mxu0 %v998_v63 }
  0x51   :  { %620 = vmatpush.bf16.msrb.mxu1 %v1006_v15 }
  0x52   :  { %704 = vmatpush.bf16.msrb.mxu2 %v1015_v30 }
  0x54   :  { %534 = vmatpush.bf16.msrb.mxu0 %v997_v0 }
  0x55   :  { %621 = vmatpush.bf16.msrb.mxu1 %v1005_v16 }
  0x56   :  { %705 = vmatpush.bf16.msrb.mxu2 %v1014_v31 }
  0x5a   :  { %706 = vmatpush.bf16.msrb.mxu2 %v1013_v32 }
  0xb4   :  { %v190_v21 = vpop.f32.mrf.mxu0 }
  0xb5   :  { %v191_v23 = vadd.f32 %v1033_v22, %v190_v21 }
  0xb7   :  { %v195_v26 = vmax.f32 %v191_v23, 0.0 }
  0xbc   :  { %v192_v24 = vpop.f32.mrf.mxu0 }
  0xbd   :  { %v193_v25 = vadd.f32 %v1033_v22, %v192_v24  ;;  %v1037_v22 = vld [vmem:[#allocation8 + $0x3] ss:$0 sm:$0xff] }
  0xbf   :  { %v196_v27 = vmax.f32 %v193_v25, 0.0 }
  0xc1   :  { %v197_v28 = vpack.c.bf16 %v196_v27, %v195_v26 }
  0xc3   :  { %274 = vmatmul.bf16.vlgmr.msra.gmra.mxu1 %v197_v28 }
 0x140   :  { %v275_v37 = vpop.f32.mrf.mxu1 }
 0x141   :  { %v276_v39 = vadd.f32 %v1034_v38, %v275_v37 }
 0x143   :  { %v280_v42 = vmax.f32 %v276_v39, 0.0 }
 0x148   :  { %v277_v40 = vpop.f32.mrf.mxu1 }
 0x149   :  { %v278_v41 = vadd.f32 %v1034_v38, %v277_v40 }
 0x14b   :  { %v281_v43 = vmax.f32 %v278_v41, 0.0  ;;  %v1039_v41 = vld [vmem:[%s1286_s6] ss:$0 sm:$0xff] }
 0x14d   :  { %v282_v44 = vpack.c.bf16 %v281_v43, %v280_v42 }
 0x14f   :  { %361 = vmatmul.bf16.vlgmr.msra.gmra.mxu2 %v282_v44 }
 0x1d2   :  { %v362_v53 = vpop.f32.mrf.mxu2 }
 0x1d3   :  { %v363_v55 = vadd.f32 %v1035_v54, %v362_v53 }
 0x1d5   :  { %v367_v58 = vmax.f32 %v363_v55, 0.0 }
 0x1da   :  { %v364_v56 = vpop.f32.mrf.mxu2 }
 0x1db   :  { %v365_v57 = vadd.f32 %v1035_v54, %v364_v56 }
 0x1dd   :  { %v368_v59 = vmax.f32 %v365_v57, 0.0 }
 0x1df   :  { %v369_v60 = vpack.c.bf16 %v368_v59, %v367_v58 }
 0x1e1   :  { %448 = vmatmul.bf16.vlgmr.msra.gmra.mxu3 %v369_v60 }
 0x264   :  { %v449_v5 = vpop.f32.mrf.mxu3 }
 0x265   :  { %v450_v7 = vadd.f32 %v1036_v6, %v449_v5 }
 0x267   :  { %v454_v10 = vmax.f32 %v450_v7, 0.0 }
 0x26c   :  { %v451_v8 = vpop.f32.mrf.mxu3 }
 0x26d   :  { %v452_v9 = vadd.f32 %v1036_v6, %v451_v8 }
 0x26f   :  { %v455_v11 = vmax.f32 %v452_v9, 0.0 }
 0x271   :  { %v456_v12 = vpack.c.bf16 %v455_v11, %v454_v10 }
 0x273   :  { %535 = vmatmul.bf16.vlgmr.msrb.gmra.mxu0 %v456_v12 }
 0x2f0   :  { %v536_v21 = vpop.f32.mrf.mxu0 }
 0x2f1   :  { %v537_v23 = vadd.f32 %v1037_v22, %v536_v21 }
 0x2f3   :  { %v541_v26 = vmax.f32 %v537_v23, 0.0 }
 0x2f8   :  { %v538_v24 = vpop.f32.mrf.mxu0 }
 0x2f9   :  { %v539_v25 = vadd.f32 %v1037_v22, %v538_v24 }
 0x2fb   :  { %v542_v27 = vmax.f32 %v539_v25, 0.0 }
 0x2fd   :  { %v543_v28 = vpack.c.bf16 %v542_v27, %v541_v26 }
 0x2ff   :  { %622 = vmatmul.bf16.vlgmr.msrb.gmra.mxu1 %v543_v28 }
 0x37c   :  { %v623_v33 = vpop.f32.mrf.mxu1 }
 0x37d   :  { %v624_v35 = vadd.f32 %v1038_v34, %v623_v33 }
 0x37f   :  { %v628_v38 = vmax.f32 %v624_v35, 0.0 }
 0x384   :  { %v625_v36 = vpop.f32.mrf.mxu1 }
 0x385   :  { %v626_v37 = vadd.f32 %v1038_v34, %v625_v36 }
 0x387   :  { %v629_v39 = vmax.f32 %v626_v37, 0.0 }
 0x389   :  { %v630_v40 = vpack.c.bf16 %v629_v39, %v628_v38 }
 0x38b   :  { %707 = vmatmul.bf16.vlgmr.msrb.gmra.mxu2 %v630_v40 }
 0x40e   :  { %v708_v42 = vpop.f32.mrf.mxu2 }
 0x40f   :  { %v709_v43 = vadd.f32 %v1039_v41, %v708_v42 }
 0x411   :  { %713 = vst [vmem:[#allocation11] sm:$0xff] %v709_v43 }
 0x416   :  { %v710_v44 = vpop.f32.mrf.mxu2 }
 0x417   :  { %v711_v45 = vadd.f32 %v1039_v41, %v710_v44 }
 0x419   :  { %714 = vst [vmem:[#allocation11 + $0x8] sm:$0xff] %v711_v45 }
 0x41a   :  { %727 = dma.vmem_to_hbm [thread:$0]  %s720_s29, 256, %s722_s9, [#allocation4], %s1202_s10, %s1202_s10, %s1203_s11  }
 0x41b   :  { %1190 = dma.done.wait [#allocation4], 256  }
 0x41c   :  { %1191 = vsyncadd [#allocation4], 4294967040 }
 0x41d   :  { %732 = vsyncpa [#allocation3], 1 }
 0x41e   :  { %733 = vsyncpa [#allocation6], 1 }
 0x41f   :  { %734 = vsyncpa [#allocation9], 1 }
 0x420   :  { %735 = vsyncpa [#allocation4], 1 }

</bundles_post_ra>
